<compile_context>
chip_gen: v6e
topology: v6e:2x2x1
jax: 0.10.0
libtpu: 0.0.40
codegen_flags: <defaults>
</compile_context>

<pallas_src>
import jax
import jax.numpy as jnp
from jax.experimental import pallas as pl
from jax.experimental.pallas import tpu as pltpu

N_CLASS = 100
TAU = 2.0
V_TH = 1.0
THRESH = TAU * V_TH  # LIF with per-step reset: spike = (W x + b >= tau * v_th)


def _round_up(x, m):
    return ((x + m - 1) // m) * m


def _snn_kernel(x_ref, w1_ref, t1_ref, w2_ref, t2_ref, w3_ref, t3_ref, o_ref):
    # x_ref: (M_pad, D) f32, rows grouped time-major as 3 blocks of B_pad rows
    #        (t = T-3, T-2, T-1), padding rows at the end.
    # t*_ref: per-column fused thresholds THRESH - b (f32, shape (1, H)).
    x = x_ref[...].astype(jnp.bfloat16)                 # cast inside the kernel

    h1 = jnp.dot(x, w1_ref[...], preferred_element_type=jnp.float32)
    s1 = (h1 >= t1_ref[...]).astype(jnp.bfloat16)       # spikes are exactly 0/1 in bf16

    h2 = jnp.dot(s1, w2_ref[...], preferred_element_type=jnp.float32)
    s2 = (h2 >= t2_ref[...]).astype(jnp.bfloat16)

    h3 = jnp.dot(s2, w3_ref[...], preferred_element_type=jnp.float32)
    s3 = (h3 >= t3_ref[...]).astype(jnp.float32)        # (M_pad, O_pad)

    # In-kernel mean over the last 3 timesteps; B_pad-aligned (sublane-aligned) slices.
    bp = o_ref.shape[0]
    o_ref[...] = (s3[0:bp] + s3[bp:2 * bp] + s3[2 * bp:3 * bp]) * (1.0 / 3.0)


def neurovpr_vanilla_snn_forward(dvs_input, params):
    """dvs_input: [B, T, C, H, W] float32. Returns [B, N_CLASS] float32."""
    w1, b1, w2, b2, w3, b3 = params
    B, T, C, H, W = dvs_input.shape
    D = C * H * W
    H1 = w1.shape[1]
    H2 = w2.shape[1]
    O = w3.shape[1]
    assert T >= 3, "module averages the last 3 timesteps"

    # Padding for lane/sublane-dense MXU + store path.
    O_pad = _round_up(O, 128)        # 100 -> 128 (unmasked lane-dense stores)
    B_pad = _round_up(B, 8)          # f32 output sublane tile
    M = 3 * B_pad                    # only the last 3 timesteps contribute (exact)
    M_pad = _round_up(M, 16)         # bf16 sublane packing for the LHS / spike intermediates

    # Glue: free reshape, slice last 3 steps, go time-major, pad batch + rows. x stays f32.
    x_flat = dvs_input.reshape(B, T, D)
    x_tb = jnp.transpose(x_flat[:, T - 3:, :], (1, 0, 2))          # [3, B, D]
    x_tb = jnp.pad(x_tb, ((0, 0), (0, B_pad - B), (0, 0)))         # [3, B_pad, D]
    x_pad = jnp.pad(x_tb.reshape(M, D), ((0, M_pad - M), (0, 0)))  # [M_pad, D]

    # Weights in bf16 ([in, out] layout -> x @ W on the MXU); last layer zero-padded to
    # 128 output columns.  Biases folded into f32 thresholds (padded columns get THRESH,
    # so padded outputs are exactly 0).
    w1b = w1.astype(jnp.bfloat16)
    w2b = w2.astype(jnp.bfloat16)
    w3b = jnp.pad(w3.astype(jnp.bfloat16), ((0, 0), (0, O_pad - O)))
    thr1 = (THRESH - b1.astype(jnp.float32)).reshape(1, H1)
    thr2 = (THRESH - b2.astype(jnp.float32)).reshape(1, H2)
    thr3 = (THRESH - jnp.pad(b3.astype(jnp.float32), (0, O_pad - O))).reshape(1, O_pad)

    vmem_spec = pl.BlockSpec(memory_space=pltpu.MemorySpace.VMEM)
    out = pl.pallas_call(
        _snn_kernel,
        out_shape=jax.ShapeDtypeStruct((B_pad, O_pad), jnp.float32),
        in_specs=[vmem_spec] * 7,
        out_specs=vmem_spec,
    )(x_pad, w1b, thr1, w2b, thr2, w3b, thr3)

    return out[:B, :O]


def init_params(key, input_dim, hidden_dims=(256, 256), output_dim=N_CLASS):
    """Deterministic init mimicking torch.nn.Linear default (uniform +-1/sqrt(fan_in)).
    Weights stored as [in, out] (transposed vs. torch)."""
    dims = [input_dim] + list(hidden_dims) + [output_dim]
    params = []
    for i in range(len(dims) - 1):
        fan_in, fan_out = dims[i], dims[i + 1]
        key, kw, kb = jax.random.split(key, 3)
        bound = 1.0 / (fan_in ** 0.5)
        w = jax.random.uniform(kw, (fan_in, fan_out), jnp.float32, -bound, bound)
        b = jax.random.uniform(kb, (fan_out,), jnp.float32, -bound, bound)
        params.extend([w, b])
    return tuple(params)


def reference_forward(dvs_input, params):
    """Pure-JAX reference mirroring the PyTorch forward loop over all T timesteps.
    Uses the same bf16-matmul / fused-threshold formulation as the kernel
    (mathematically identical to v = (Wx+b)/tau >= v_th) so the comparison is tight."""
    w1, b1, w2, b2, w3, b3 = params
    B, T, C, H, W = dvs_input.shape
    xr = dvs_input.reshape(B, T, -1)
    w1b, w2b, w3b = (w.astype(jnp.bfloat16) for w in (w1, w2, w3))
    t1, t2, t3 = (THRESH - b1, THRESH - b2, THRESH - b3)
    outs = []
    for t in range(T):
        h = xr[:, t, :].astype(jnp.bfloat16)
        h = (jnp.dot(h, w1b, preferred_element_type=jnp.float32) >= t1).astype(jnp.bfloat16)
        h = (jnp.dot(h, w2b, preferred_element_type=jnp.float32) >= t2).astype(jnp.bfloat16)
        h = (jnp.dot(h, w3b, preferred_element_type=jnp.float32) >= t3).astype(jnp.float32)
        outs.append(h)
    return jnp.stack(outs[-3:], axis=1).mean(axis=1)


if __name__ == "__main__":
    key = jax.random.PRNGKey(0)
    k_in, k_params = jax.random.split(key)

    B, T, C, H, W = 2, 8, 4, 16, 16          # small shapes; D = 1024
    input_dim = C * H * W

    # Scale input so some neurons actually cross threshold.
    dvs_input = 4.0 * jax.random.normal(k_in, (B, T, C, H, W), jnp.float32)
    params = init_params(k_params, input_dim, hidden_dims=(256, 256), output_dim=N_CLASS)

    fwd = jax.jit(neurovpr_vanilla_snn_forward)
    out = jax.block_until_ready(fwd(dvs_input, params))

    ref = reference_forward(dvs_input, params)
    assert out.shape == (B, N_CLASS)

    # Spikes are hard 0/1 decisions: a ULP-level accumulation-order difference between the
    # Pallas MXU path and the XLA reference could in principle flip a borderline neuron,
    # shifting one output entry by 1/3.  Require (near-)exact agreement while tolerating at
    # most a couple of such boundary flips.
    mismatches = int(jnp.sum(jnp.abs(out - ref) > 1e-5))
    assert mismatches <= max(2, out.size // 100), (
        f"Pallas output mismatch vs reference: {mismatches} / {out.size} entries differ")

    print("KERNEL_OK")
</pallas_src>

<mosaic_0001>
module attributes {stable_mosaic.version = 11 : i64} {
  func.func @_snn_kernel(%arg0: memref<32x1024xf32, #tpu.memory_space<vmem>>, %arg1: memref<1024x256xbf16, #tpu.memory_space<vmem>>, %arg2: memref<1x256xf32, #tpu.memory_space<vmem>>, %arg3: memref<256x256xbf16, #tpu.memory_space<vmem>>, %arg4: memref<1x256xf32, #tpu.memory_space<vmem>>, %arg5: memref<256x128xbf16, #tpu.memory_space<vmem>>, %arg6: memref<1x128xf32, #tpu.memory_space<vmem>>, %arg7: memref<8x128xf32, #tpu.memory_space<vmem>>) attributes {dimension_semantics = [], scalar_prefetch = 0 : i64, scratch_operands = 0 : i64, tpu.core_type = #tpu.core_type<tc>} {
    %c0 = arith.constant 0 : index
    %c0_0 = arith.constant 0 : index
    %0 = vector.load %arg0[%c0, %c0_0] : memref<32x1024xf32, #tpu.memory_space<vmem>>, vector<32x1024xf32>
    %1 = arith.truncf %0 : vector<32x1024xf32> to vector<32x1024xbf16>
    %c0_1 = arith.constant 0 : index
    %c0_2 = arith.constant 0 : index
    %2 = vector.load %arg1[%c0_1, %c0_2] : memref<1024x256xbf16, #tpu.memory_space<vmem>>, vector<1024x256xbf16>
    %cst = arith.constant dense<0.000000e+00> : vector<32x256xf32>
    %3 = tpu.matmul %1, %2, %cst {dimension_numbers = #tpu.dot_dimension_numbers<[1], [0], [0], [1], [0, 0, 1, 1], [], []>} : vector<32x1024xbf16>, vector<1024x256xbf16>, vector<32x256xf32> -> vector<32x256xf32>
    %c0_3 = arith.constant 0 : index
    %c0_4 = arith.constant 0 : index
    %4 = vector.load %arg2[%c0_3, %c0_4] : memref<1x256xf32, #tpu.memory_space<vmem>>, vector<1x256xf32>
    %5 = vector.broadcast %4 : vector<1x256xf32> to vector<32x256xf32>
    %6 = arith.cmpf oge, %3, %5 : vector<32x256xf32>
    %7 = arith.extui %6 : vector<32x256xi1> to vector<32x256xi32>
    %8 = arith.sitofp %7 : vector<32x256xi32> to vector<32x256xf32>
    %9 = arith.truncf %8 : vector<32x256xf32> to vector<32x256xbf16>
    %c0_5 = arith.constant 0 : index
    %c0_6 = arith.constant 0 : index
    %10 = vector.load %arg3[%c0_5, %c0_6] : memref<256x256xbf16, #tpu.memory_space<vmem>>, vector<256x256xbf16>
    %cst_7 = arith.constant dense<0.000000e+00> : vector<32x256xf32>
    %11 = tpu.matmul %9, %10, %cst_7 {dimension_numbers = #tpu.dot_dimension_numbers<[1], [0], [0], [1], [0, 0, 1, 1], [], []>} : vector<32x256xbf16>, vector<256x256xbf16>, vector<32x256xf32> -> vector<32x256xf32>
    %c0_8 = arith.constant 0 : index
    %c0_9 = arith.constant 0 : index
    %12 = vector.load %arg4[%c0_8, %c0_9] : memref<1x256xf32, #tpu.memory_space<vmem>>, vector<1x256xf32>
    %13 = vector.broadcast %12 : vector<1x256xf32> to vector<32x256xf32>
    %14 = arith.cmpf oge, %11, %13 : vector<32x256xf32>
    %15 = arith.extui %14 : vector<32x256xi1> to vector<32x256xi32>
    %16 = arith.sitofp %15 : vector<32x256xi32> to vector<32x256xf32>
    %17 = arith.truncf %16 : vector<32x256xf32> to vector<32x256xbf16>
    %c0_10 = arith.constant 0 : index
    %c0_11 = arith.constant 0 : index
    %18 = vector.load %arg5[%c0_10, %c0_11] : memref<256x128xbf16, #tpu.memory_space<vmem>>, vector<256x128xbf16>
    %cst_12 = arith.constant dense<0.000000e+00> : vector<32x128xf32>
    %19 = tpu.matmul %17, %18, %cst_12 {dimension_numbers = #tpu.dot_dimension_numbers<[1], [0], [0], [1], [0, 0, 1, 1], [], []>} : vector<32x256xbf16>, vector<256x128xbf16>, vector<32x128xf32> -> vector<32x128xf32>
    %c0_13 = arith.constant 0 : index
    %c0_14 = arith.constant 0 : index
    %20 = vector.load %arg6[%c0_13, %c0_14] : memref<1x128xf32, #tpu.memory_space<vmem>>, vector<1x128xf32>
    %21 = vector.broadcast %20 : vector<1x128xf32> to vector<32x128xf32>
    %22 = arith.cmpf oge, %19, %21 : vector<32x128xf32>
    %23 = arith.extui %22 : vector<32x128xi1> to vector<32x128xi32>
    %24 = arith.sitofp %23 : vector<32x128xi32> to vector<32x128xf32>
    %25 = vector.extract_strided_slice %24 {offsets = [0, 0], sizes = [8, 128], strides = [1, 1]} : vector<32x128xf32> to vector<8x128xf32>
    %26 = vector.extract_strided_slice %24 {offsets = [8, 0], sizes = [8, 128], strides = [1, 1]} : vector<32x128xf32> to vector<8x128xf32>
    %27 = arith.addf %25, %26 : vector<8x128xf32>
    %28 = vector.extract_strided_slice %24 {offsets = [16, 0], sizes = [8, 128], strides = [1, 1]} : vector<32x128xf32> to vector<8x128xf32>
    %29 = arith.addf %27, %28 : vector<8x128xf32>
    %cst_15 = arith.constant 0.333333343 : f32
    %30 = vector.broadcast %cst_15 : f32 to vector<8x128xf32>
    %31 = arith.mulf %29, %30 : vector<8x128xf32>
    %c0_16 = arith.constant 0 : index
    %c0_17 = arith.constant 0 : index
    %32 = vector.load %arg7[%c0_16, %c0_17] : memref<8x128xf32, #tpu.memory_space<vmem>>, vector<8x128xf32>
    tpu.vector_store %arg7[%c0_16, %c0_17], %31 {strides = array<i32>} : memref<8x128xf32, #tpu.memory_space<vmem>>, vector<8x128xf32>,
    return
  }
}

</mosaic_0001>

<bundles_post_ra>
// kernel: neurovpr_vanilla_snn_forward.1
= control target key start
LH: loop header
LB: loop body
LE: loop exit
PB: predicated region body
PF: predicated region fallthrough
CT: control target
= control target key end

     0   :  { %s2768_s1 = inlined_call_operand.vmem [shape: bf16[1024,256], index: 1, kind: input, shape index: {}]   ;;  %s2769_s0 = inlined_call_operand.vmem [shape: f32[32,1024], index: 0, kind: input, shape index: {}]   ;;  %s2770_s3 = inlined_call_operand.vmem [shape: bf16[256,256], index: 3, kind: input, shape index: {}]   ;;  %s2771_s5 = inlined_call_operand.vmem [shape: bf16[256,128], index: 5, kind: input, shape index: {}]   ;;  %s2772_s2 = inlined_call_operand.vmem [shape: f32[1,256], index: 2, kind: input, shape index: {}]   ;;  %s2773_s4 = inlined_call_operand.vmem [shape: f32[1,256], index: 4, kind: input, shape index: {}]   ;;  %s2774_s6 = inlined_call_operand.vmem [shape: f32[1,128], index: 6, kind: input, shape index: {}]   ;;  %s2775_s7 = inlined_call_operand.vmem [shape: f32[8,128], index: 7, kind: output, shape index: {}]  }
   0x1   :  { %v1822_v0 = vld [vmem:[%s2768_s1 + $0x74] ss:$8 sps:$4 sm:$0xff]   ;;  %v1826_v2 = vld [vmem:[%s2768_s1 + $0x70] ss:$8 sps:$4 sm:$0xff]   ;;  %v1828_v4 = vld [vmem:[%s2768_s1 + $0x64] ss:$8 sps:$4 sm:$0xff]  }
   0x2   :  { %v1824_v1 = vld [vmem:[%s2768_s1 + $0x174] ss:$8 sps:$4 sm:$0xff]   ;;  %843 = vmatprep.subr.bf16.mxu0 %v1822_v0  ;;  %v1827_v3 = vld [vmem:[%s2768_s1 + $0x170] ss:$8 sps:$4 sm:$0xff]   ;;  %v1830_v5 = vld [vmem:[%s2768_s1 + $0x164] ss:$8 sps:$4 sm:$0xff]  }
   0x3   :  { %896 = vmatprep.subr.bf16.mxu1 %v1824_v1  ;;  %844 = vmatpush1.bf16.msra.mxu0 %v1826_v2  ;;  %v1832_v6 = vld [vmem:[%s2768_s1 + $0x60] ss:$8 sps:$4 sm:$0xff]   ;;  %v1834_v8 = vld [vmem:[%s2768_s1 + $0x54] ss:$8 sps:$4 sm:$0xff]   ;;  %v1838_v10 = vld [vmem:[%s2768_s1 + $0x50] ss:$8 sps:$4 sm:$0xff]  }
   0x4   :  { %897 = vmatpush1.bf16.msra.mxu1 %v1827_v3  ;;  %845 = vmatprep.subr.bf16.mxu0 %v1828_v4  ;;  %v1833_v7 = vld [vmem:[%s2768_s1 + $0x160] ss:$8 sps:$4 sm:$0xff]   ;;  %v1836_v9 = vld [vmem:[%s2768_s1 + $0x154] ss:$8 sps:$4 sm:$0xff]   ;;  %v1839_v11 = vld [vmem:[%s2768_s1 + $0x150] ss:$8 sps:$4 sm:$0xff]  }
   0x5   :  { %898 = vmatprep.subr.bf16.mxu1 %v1830_v5  ;;  %v1840_v12 = vld [vmem:[%s2768_s1 + $0x44] ss:$8 sps:$4 sm:$0xff]   ;;  %v1844_v14 = vld [vmem:[%s2768_s1 + $0x40] ss:$8 sps:$4 sm:$0xff]   ;;  %v1846_v16 = vld [vmem:[%s2768_s1 + $0x34] ss:$8 sps:$4 sm:$0xff]  }
   0x6   :  { %v1842_v13 = vld [vmem:[%s2768_s1 + $0x144] ss:$8 sps:$4 sm:$0xff]   ;;  %v1845_v15 = vld [vmem:[%s2768_s1 + $0x140] ss:$8 sps:$4 sm:$0xff]   ;;  %v1848_v17 = vld [vmem:[%s2768_s1 + $0x134] ss:$8 sps:$4 sm:$0xff]  }
   0x7   :  { %846 = vmatpush1.bf16.msra.mxu0 %v1832_v6  ;;  %v1850_v18 = vld [vmem:[%s2768_s1 + $0x30] ss:$8 sps:$4 sm:$0xff]   ;;  %v1852_v20 = vld [vmem:[%s2768_s1 + $0x24] ss:$8 sps:$4 sm:$0xff]   ;;  %v1856_v22 = vld [vmem:[%s2768_s1 + $0x20] ss:$8 sps:$4 sm:$0xff]  }
   0x8   :  { %899 = vmatpush1.bf16.msra.mxu1 %v1833_v7  ;;  %847 = vmatprep.subr.bf16.mxu0 %v1834_v8  ;;  %v1851_v19 = vld [vmem:[%s2768_s1 + $0x130] ss:$8 sps:$4 sm:$0xff]   ;;  %v1854_v21 = vld [vmem:[%s2768_s1 + $0x124] ss:$8 sps:$4 sm:$0xff]   ;;  %v1857_v23 = vld [vmem:[%s2768_s1 + $0x120] ss:$8 sps:$4 sm:$0xff]  }
   0x9   :  { %900 = vmatprep.subr.bf16.mxu1 %v1836_v9  ;;  %v1858_v24 = vld [vmem:[%s2768_s1 + $0x14] ss:$8 sps:$4 sm:$0xff]   ;;  %v1862_v26 = vld [vmem:[%s2768_s1 + $0x10] ss:$8 sps:$4 sm:$0xff]   ;;  %v1864_v28 = vld [vmem:[%s2768_s1 + $0x4] ss:$8 sps:$4 sm:$0xff]  }
   0xa   :  { %v1860_v25 = vld [vmem:[%s2768_s1 + $0x114] ss:$8 sps:$4 sm:$0xff]   ;;  %v1863_v27 = vld [vmem:[%s2768_s1 + $0x110] ss:$8 sps:$4 sm:$0xff]   ;;  %v1866_v29 = vld [vmem:[%s2768_s1 + $0x104] ss:$8 sps:$4 sm:$0xff]  }
   0xb   :  { %848 = vmatpush1.bf16.msra.mxu0 %v1838_v10  ;;  %v1868_v30 = vld [vmem:[%s2768_s1] ss:$8 sps:$4 sm:$0xff]   ;;  %v1870_v32 = vld [vmem:[%s2768_s1 + $0xf4] ss:$8 sps:$4 sm:$0xff]   ;;  %v1874_v34 = vld [vmem:[%s2768_s1 + $0xf0] ss:$8 sps:$4 sm:$0xff]  }
   0xc   :  { %901 = vmatpush1.bf16.msra.mxu1 %v1839_v11  ;;  %849 = vmatprep.subr.bf16.mxu0 %v1840_v12  ;;  %v1869_v31 = vld [vmem:[%s2768_s1 + $0x100] ss:$8 sps:$4 sm:$0xff]   ;;  %v1872_v33 = vld [vmem:[%s2768_s1 + $0x1f4] ss:$8 sps:$4 sm:$0xff]   ;;  %v1875_v35 = vld [vmem:[%s2768_s1 + $0x1f0] ss:$8 sps:$4 sm:$0xff]  }
   0xd   :  { %902 = vmatprep.subr.bf16.mxu1 %v1842_v13  ;;  %v1876_v36 = vld [vmem:[%s2768_s1 + $0xe4] ss:$8 sps:$4 sm:$0xff]   ;;  %v1880_v38 = vld [vmem:[%s2768_s1 + $0xe0] ss:$8 sps:$4 sm:$0xff]   ;;  %v1882_v40 = vld [vmem:[%s2768_s1 + $0xd4] ss:$8 sps:$4 sm:$0xff]  }
   0xe   :  { %v1878_v37 = vld [vmem:[%s2768_s1 + $0x1e4] ss:$8 sps:$4 sm:$0xff]   ;;  %v1881_v39 = vld [vmem:[%s2768_s1 + $0x1e0] ss:$8 sps:$4 sm:$0xff]   ;;  %v1884_v41 = vld [vmem:[%s2768_s1 + $0x1d4] ss:$8 sps:$4 sm:$0xff]  }
   0xf   :  { %850 = vmatpush1.bf16.msra.mxu0 %v1844_v14  ;;  %v1886_v42 = vld [vmem:[%s2768_s1 + $0xd0] ss:$8 sps:$4 sm:$0xff]   ;;  %v1888_v44 = vld [vmem:[%s2768_s1 + $0xc4] ss:$8 sps:$4 sm:$0xff]   ;;  %v1892_v50 = vld [vmem:[%s2768_s1 + $0xc0] ss:$8 sps:$4 sm:$0xff]  }
  0x10   :  { %903 = vmatpush1.bf16.msra.mxu1 %v1845_v15  ;;  %851 = vmatprep.subr.bf16.mxu0 %v1846_v16  ;;  %v1887_v43 = vld [vmem:[%s2768_s1 + $0x1d0] ss:$8 sps:$4 sm:$0xff]   ;;  %v1890_v45 = vld [vmem:[%s2768_s1 + $0x1c4] ss:$8 sps:$4 sm:$0xff]   ;;  %v1893_v51 = vld [vmem:[%s2768_s1 + $0x1c0] ss:$8 sps:$4 sm:$0xff]  }
  0x11   :  { %904 = vmatprep.subr.bf16.mxu1 %v1848_v17  ;;  %v28_v46 = vld [vmem:[%s2769_s0 + $0x8] sm:$0xff]  ;;  %v30_v48 = vld [vmem:[%s2769_s0 + $0x18] sm:$0xff]  ;;  %v27_v6 = vld [vmem:[%s2769_s0] sm:$0xff] }
  0x12   :  { %v36_v47 = vld [vmem:[%s2769_s0 + $0x48] sm:$0xff]  ;;  %v38_v49 = vld [vmem:[%s2769_s0 + $0x58] sm:$0xff]  ;;  %v35_v7 = vld [vmem:[%s2769_s0 + $0x40] sm:$0xff] }
  0x13   :  { %852 = vmatpush1.bf16.msra.mxu0 %v1850_v18  ;;  %v1894_v52 = vld [vmem:[%s2768_s1 + $0xb4] ss:$8 sps:$4 sm:$0xff]   ;;  %v60_v53 = vpack.c.bf16 %v36_v47, %v28_v46  ;;  %v62_v54 = vpack.c.bf16 %v38_v49, %v30_v48  ;;  %v1898_v56 = vld [vmem:[%s2768_s1 + $0xb0] ss:$8 sps:$4 sm:$0xff]   ;;  %v1900_v58 = vld [vmem:[%s2768_s1 + $0xa4] ss:$8 sps:$4 sm:$0xff]   ;;  %v59_v12 = vpack.c.bf16 %v35_v7, %v27_v6 }
  0x14   :  { %905 = vmatpush1.bf16.msra.mxu1 %v1851_v19  ;;  %853 = vmatprep.subr.bf16.mxu0 %v1852_v20  ;;  %v1896_v55 = vld [vmem:[%s2768_s1 + $0x1b4] ss:$8 sps:$4 sm:$0xff]   ;;  %v1899_v57 = vld [vmem:[%s2768_s1 + $0x1b0] ss:$8 sps:$4 sm:$0xff]   ;;  %v1902_v59 = vld [vmem:[%s2768_s1 + $0x1a4] ss:$8 sps:$4 sm:$0xff]  }
  0x15   :  { %906 = vmatprep.subr.bf16.mxu1 %v1854_v21  ;;  %875 = vmatprep.mubr.bf16.mxu0 %v60_v53  ;;  %v1904_v60 = vld [vmem:[%s2768_s1 + $0xa0] ss:$8 sps:$4 sm:$0xff]   ;;  %v1906_v62 = vld [vmem:[%s2768_s1 + $0x94] ss:$8 sps:$4 sm:$0xff]   ;;  %v1910_v0 = vld [vmem:[%s2768_s1 + $0x90] ss:$8 sps:$4 sm:$0xff]  }
  0x16   :  { %928 = vmatprep.mubr.bf16.mxu1 %v62_v54  ;;  %v1905_v61 = vld [vmem:[%s2768_s1 + $0x1a0] ss:$8 sps:$4 sm:$0xff]   ;;  %v1908_v63 = vld [vmem:[%s2768_s1 + $0x194] ss:$8 sps:$4 sm:$0xff]   ;;  %v1911_v1 = vld [vmem:[%s2768_s1 + $0x190] ss:$8 sps:$4 sm:$0xff]  }
  0x17   :  { %854 = vmatpush1.bf16.msra.mxu0 %v1856_v22  ;;  %v1912_v2 = vld [vmem:[%s2768_s1 + $0x84] ss:$8 sps:$4 sm:$0xff]   ;;  %v1916_v4 = vld [vmem:[%s2768_s1 + $0x80] ss:$8 sps:$4 sm:$0xff]   ;;  %v29_v8 = vld [vmem:[%s2769_s0 + $0x10] sm:$0xff] }
  0x18   :  { %907 = vmatpush1.bf16.msra.mxu1 %v1857_v23  ;;  %855 = vmatprep.subr.bf16.mxu0 %v1858_v24  ;;  %v1914_v3 = vld [vmem:[%s2768_s1 + $0x184] ss:$8 sps:$4 sm:$0xff]   ;;  %v1917_v5 = vld [vmem:[%s2768_s1 + $0x180] ss:$8 sps:$4 sm:$0xff]   ;;  %v37_v9 = vld [vmem:[%s2769_s0 + $0x50] sm:$0xff] }
  0x19   :  { %908 = vmatprep.subr.bf16.mxu1 %v1860_v25  ;;  %v1920_v10 = vld [vmem:[%s2768_s1 + $0x274] ss:$8 sps:$4 sm:$0xff]   ;;  %v61_v13 = vpack.c.bf16 %v37_v9, %v29_v8  ;;  %v1918_v14 = vld [vmem:[%s2768_s1 + $0x270] ss:$8 sps:$4 sm:$0xff]   ;;  %v1926_v16 = vld [vmem:[%s2768_s1 + $0x264] ss:$8 sps:$4 sm:$0xff]  }
  0x1a   :  { %v1923_v11 = vld [vmem:[%s2768_s1 + $0x374] ss:$8 sps:$4 sm:$0xff]   ;;  %v1921_v15 = vld [vmem:[%s2768_s1 + $0x370] ss:$8 sps:$4 sm:$0xff]   ;;  %v1929_v17 = vld [vmem:[%s2768_s1 + $0x364] ss:$8 sps:$4 sm:$0xff]  }
  0x1b   :  { %856 = vmatpush1.bf16.msra.mxu0 %v1862_v26  ;;  %v1924_v18 = vld [vmem:[%s2768_s1 + $0x260] ss:$8 sps:$4 sm:$0xff]   ;;  %v1932_v20 = vld [vmem:[%s2768_s1 + $0x254] ss:$8 sps:$4 sm:$0xff]   ;;  %v1930_v22 = vld [vmem:[%s2768_s1 + $0x250] ss:$8 sps:$4 sm:$0xff]  }
  0x1c   :  { %909 = vmatpush1.bf16.msra.mxu1 %v1863_v27  ;;  %857 = vmatprep.subr.bf16.mxu0 %v1864_v28  ;;  %v1927_v19 = vld [vmem:[%s2768_s1 + $0x360] ss:$8 sps:$4 sm:$0xff]   ;;  %v1935_v21 = vld [vmem:[%s2768_s1 + $0x354] ss:$8 sps:$4 sm:$0xff]   ;;  %v1933_v23 = vld [vmem:[%s2768_s1 + $0x350] ss:$8 sps:$4 sm:$0xff]  }
  0x1d   :  { %910 = vmatprep.subr.bf16.mxu1 %v1866_v29  ;;  %v1938_v24 = vld [vmem:[%s2768_s1 + $0x244] ss:$8 sps:$4 sm:$0xff]   ;;  %v1936_v26 = vld [vmem:[%s2768_s1 + $0x240] ss:$8 sps:$4 sm:$0xff]   ;;  %v1944_v28 = vld [vmem:[%s2768_s1 + $0x234] ss:$8 sps:$4 sm:$0xff]  }
  0x1e   :  { %v1941_v25 = vld [vmem:[%s2768_s1 + $0x344] ss:$8 sps:$4 sm:$0xff]   ;;  %v1939_v27 = vld [vmem:[%s2768_s1 + $0x340] ss:$8 sps:$4 sm:$0xff]   ;;  %v1947_v29 = vld [vmem:[%s2768_s1 + $0x334] ss:$8 sps:$4 sm:$0xff]  }
  0x1f   :  { %858 = vmatpush1.bf16.msra.mxu0 %v1868_v30  ;;  %v1942_v30 = vld [vmem:[%s2768_s1 + $0x230] ss:$8 sps:$4 sm:$0xff]   ;;  %v1951_v46 = vld [vmem:[%s2768_s1 + $0x320] ss:$8 sps:$4 sm:$0xff]   ;;  %v1956_v48 = vld [vmem:[%s2768_s1 + $0x214] ss:$8 sps:$4 sm:$0xff]  }
  0x20   :  { %911 = vmatpush1.bf16.msra.mxu1 %v1869_v31  ;;  %859 = vmatprep.subr.bf16.mxu0 %v1870_v32  ;;  %v1945_v31 = vld [vmem:[%s2768_s1 + $0x330] ss:$8 sps:$4 sm:$0xff]   ;;  %v1950_v32 = vld [vmem:[%s2768_s1 + $0x224] ss:$8 sps:$4 sm:$0xff]   ;;  %v1959_v49 = vld [vmem:[%s2768_s1 + $0x314] ss:$8 sps:$4 sm:$0xff]  }
  0x21   :  { %912 = vmatprep.subr.bf16.mxu1 %v1872_v33  ;;  %v1953_v33 = vld [vmem:[%s2768_s1 + $0x324] ss:$8 sps:$4 sm:$0xff]   ;;  %v1980_v6 = vld [vmem:[%s2768_s1 + $0x2d4] ss:$8 sps:$4 sm:$0xff]   ;;  %v1978_v8 = vld [vmem:[%s2768_s1 + $0x2d0] ss:$8 sps:$4 sm:$0xff]  }
  0x22   :  { %v1965_v53 = vld [vmem:[%s2768_s1 + $0x304] ss:$8 sps:$4 sm:$0xff]   ;;  %v1983_v7 = vld [vmem:[%s2768_s1 + $0x3d4] ss:$8 sps:$4 sm:$0xff]   ;;  %v1981_v9 = vld [vmem:[%s2768_s1 + $0x3d0] ss:$8 sps:$4 sm:$0xff]  }
  0x23   :  { %860 = vmatpush2.bf16.msra.mxu0 %v1874_v34  ;;  %v44_v34 = vld [vmem:[%s2769_s0 + $0x88] sm:$0xff] }
  0x24   :  { %913 = vmatpush2.bf16.msra.mxu1 %v1875_v35  ;;  %861 = vmatprep.subr.bf16.mxu0 %v1876_v36  ;;  %v52_v35 = vld [vmem:[%s2769_s0 + $0xc8] sm:$0xff]  ;;  %v46_v36 = vld [vmem:[%s2769_s0 + $0x98] sm:$0xff] }
  0x25   :  { %914 = vmatprep.subr.bf16.mxu1 %v1878_v37  ;;  %v68_v37 = vpack.c.bf16 %v52_v35, %v44_v34  ;;  %v32_v54 = vld [vmem:[%s2769_s0 + $0x28] sm:$0xff] }
  0x26   :  { %v48_v34 = vld [vmem:[%s2769_s0 + $0xa8] sm:$0xff] }
  0x27   :  { %862 = vmatpush2.bf16.msra.mxu0 %v1880_v38  ;;  %v54_v38 = vld [vmem:[%s2769_s0 + $0xd8] sm:$0xff]  ;;  %v56_v35 = vld [vmem:[%s2769_s0 + $0xe8] sm:$0xff] }
  0x28   :  { %915 = vmatpush2.bf16.msra.mxu1 %v1881_v39  ;;  %863 = vmatprep.subr.bf16.mxu0 %v1882_v40  ;;  %v43_v39 = vld [vmem:[%s2769_s0 + $0x80] sm:$0xff] }
  0x29   :  { %916 = vmatprep.subr.bf16.mxu1 %v1884_v41  ;;  %v51_v40 = vld [vmem:[%s2769_s0 + $0xc0] sm:$0xff]  ;;  %v70_v41 = vpack.c.bf16 %v54_v38, %v46_v36  ;;  %v50_v36 = vld [vmem:[%s2769_s0 + $0xb8] sm:$0xff] }
  0x2b   :  { %864 = vmatpush2.bf16.msra.mxu0 %v1886_v42  ;;  %v67_v42 = vpack.c.bf16 %v51_v40, %v43_v39  ;;  %v72_v40 = vpack.c.bf16 %v56_v35, %v48_v34 }
  0x2c   :  { %917 = vmatpush2.bf16.msra.mxu1 %v1887_v43  ;;  %865 = vmatprep.subr.bf16.mxu0 %v1888_v44  ;;  %v45_v43 = vld [vmem:[%s2769_s0 + $0x90] sm:$0xff] }
  0x2d   :  { %918 = vmatprep.subr.bf16.mxu1 %v1890_v45  ;;  %v53_v44 = vld [vmem:[%s2769_s0 + $0xd0] sm:$0xff]  ;;  %v1948_v45 = vld [vmem:[%s2768_s1 + $0x220] ss:$8 sps:$4 sm:$0xff]  }
  0x2e   :  { %v69_v47 = vpack.c.bf16 %v53_v44, %v45_v43  ;;  %v55_v43 = vld [vmem:[%s2769_s0 + $0xe0] sm:$0xff]  ;;  %v49_v44 = vld [vmem:[%s2769_s0 + $0xb0] sm:$0xff] }
  0x2f   :  { %866 = vmatpush2.bf16.msra.mxu0 %v1892_v50  ;;  %v1954_v50 = vld [vmem:[%s2768_s1 + $0x210] ss:$8 sps:$4 sm:$0xff]  }
  0x30   :  { %919 = vmatpush2.bf16.msra.mxu1 %v1893_v51  ;;  %867 = vmatprep.subr.bf16.mxu0 %v1894_v52  ;;  %v1957_v51 = vld [vmem:[%s2768_s1 + $0x310] ss:$8 sps:$4 sm:$0xff]   ;;  %v1962_v52 = vld [vmem:[%s2768_s1 + $0x204] ss:$8 sps:$4 sm:$0xff]  }
  0x31   :  { %920 = vmatprep.subr.bf16.mxu1 %v1896_v55  ;;  %v40_v55 = vld [vmem:[%s2769_s0 + $0x68] sm:$0xff] }
  0x33   :  { %868 = vmatpush2.bf16.msra.mxu0 %v1898_v56  ;;  %v34_v56 = vld [vmem:[%s2769_s0 + $0x38] sm:$0xff] }
  0x34   :  { %921 = vmatpush2.bf16.msra.mxu1 %v1899_v57  ;;  %869 = vmatprep.subr.bf16.mxu0 %v1900_v58  ;;  %v42_v57 = vld [vmem:[%s2769_s0 + $0x78] sm:$0xff]  ;;  %v1960_v58 = vld [vmem:[%s2768_s1 + $0x200] ss:$8 sps:$4 sm:$0xff]  }
  0x35   :  { %922 = vmatprep.subr.bf16.mxu1 %v1902_v59  ;;  %v1963_v59 = vld [vmem:[%s2768_s1 + $0x300] ss:$8 sps:$4 sm:$0xff]  }
  0x37   :  { %870 = vmatpush2.bf16.msra.mxu0 %v1904_v60  ;;  %v64_v60 = vpack.c.bf16 %v40_v55, %v32_v54  ;;  %v2025_v54 = vld [vmem:[%s2770_s3 + $0x44] ss:$8 sps:$4 sm:$0xff]   ;;  %v2023_v55 = vld [vmem:[%s2770_s3 + $0x40] ss:$8 sps:$4 sm:$0xff]  }
  0x38   :  { %923 = vmatpush2.bf16.msra.mxu1 %v1905_v61  ;;  %871 = vmatprep.subr.bf16.mxu0 %v1906_v62  ;;  %v66_v61 = vpack.c.bf16 %v42_v57, %v34_v56  ;;  %v1968_v62 = vld [vmem:[%s2768_s1 + $0x2f4] ss:$8 sps:$4 sm:$0xff]   ;;  %v2026_v57 = vld [vmem:[%s2770_s3 + $0x30] ss:$8 sps:$4 sm:$0xff]  }
  0x39   :  { %924 = vmatprep.subr.bf16.mxu1 %v1908_v63  ;;  %v1971_v63 = vld [vmem:[%s2768_s1 + $0x3f4] ss:$8 sps:$4 sm:$0xff]  }
  0x3a   :  { %v2028_v56 = vld [vmem:[%s2770_s3 + $0x34] ss:$8 sps:$4 sm:$0xff]  }
  0x3b   :  { %872 = vmatpush2.bf16.msra.mxu0 %v1910_v0  ;;  %v1966_v0 = vld [vmem:[%s2768_s1 + $0x2f0] ss:$8 sps:$4 sm:$0xff]  }
  0x3c   :  { %925 = vmatpush2.bf16.msra.mxu1 %v1911_v1  ;;  %873 = vmatprep.subr.bf16.mxu0 %v1912_v2  ;;  %v1969_v1 = vld [vmem:[%s2768_s1 + $0x3f0] ss:$8 sps:$4 sm:$0xff]   ;;  %v1974_v2 = vld [vmem:[%s2768_s1 + $0x2e4] ss:$8 sps:$4 sm:$0xff]  }
  0x3d   :  { %926 = vmatprep.subr.bf16.mxu1 %v1914_v3  ;;  %v1977_v3 = vld [vmem:[%s2768_s1 + $0x3e4] ss:$8 sps:$4 sm:$0xff]  }
  0x3f   :  { %874 = vmatpush2.bf16.msra.mxu0 %v1916_v4  ;;  %v1972_v4 = vld [vmem:[%s2768_s1 + $0x2e0] ss:$8 sps:$4 sm:$0xff]  }
  0x40   :  { %927 = vmatpush2.bf16.msra.mxu1 %v1917_v5  ;;  %949 = vmatprep.subr.bf16.mxu0 %v1920_v10  ;;  %v1975_v5 = vld [vmem:[%s2768_s1 + $0x3e0] ss:$8 sps:$4 sm:$0xff]   ;;  %v1986_v10 = vld [vmem:[%s2768_s1 + $0x2c4] ss:$8 sps:$4 sm:$0xff]  }
  0x41   :  { %1002 = vmatprep.subr.bf16.mxu1 %v1923_v11  ;;  %v1989_v11 = vld [vmem:[%s2768_s1 + $0x3c4] ss:$8 sps:$4 sm:$0xff]  }
  0x42   :  { %876 = vmatmul.mubr.bf16.vlgmr.msra.gmra.mxu0 %v59_v12  ;;  %v1984_v12 = vld [vmem:[%s2768_s1 + $0x2c0] ss:$8 sps:$4 sm:$0xff]  }
  0x43   :  { %929 = vmatmul.mubr.bf16.vlgmr.msra.gmra.mxu1 %v61_v13  ;;  %950 = vmatpush1.bf16.msra.mxu0 %v1918_v14  ;;  %v1987_v13 = vld [vmem:[%s2768_s1 + $0x3c0] ss:$8 sps:$4 sm:$0xff]   ;;  %v1992_v14 = vld [vmem:[%s2768_s1 + $0x2b4] ss:$8 sps:$4 sm:$0xff]  }
  0x44   :  { %1003 = vmatpush1.bf16.msra.mxu1 %v1921_v15  ;;  %951 = vmatprep.subr.bf16.mxu0 %v1926_v16  ;;  %v1995_v15 = vld [vmem:[%s2768_s1 + $0x3b4] ss:$8 sps:$4 sm:$0xff]   ;;  %v1990_v16 = vld [vmem:[%s2768_s1 + $0x2b0] ss:$8 sps:$4 sm:$0xff]  }
  0x45   :  { %1004 = vmatprep.subr.bf16.mxu1 %v1929_v17  ;;  %885 = vmatprep.mubr.bf16.mxu0 %v68_v37  ;;  %v1993_v17 = vld [vmem:[%s2768_s1 + $0x3b0] ss:$8 sps:$4 sm:$0xff]  }
  0x46   :  { %938 = vmatprep.mubr.bf16.mxu1 %v70_v41  ;;  %v58_v37 = vld [vmem:[%s2769_s0 + $0xf8] sm:$0xff] }
  0x47   :  { %952 = vmatpush1.bf16.msra.mxu0 %v1924_v18  ;;  %v1998_v18 = vld [vmem:[%s2768_s1 + $0x2a4] ss:$8 sps:$4 sm:$0xff]   ;;  %v74_v41 = vpack.c.bf16 %v58_v37, %v50_v36 }
  0x48   :  { %1005 = vmatpush1.bf16.msra.mxu1 %v1927_v19  ;;  %953 = vmatprep.subr.bf16.mxu0 %v1932_v20  ;;  %v2001_v19 = vld [vmem:[%s2768_s1 + $0x3a4] ss:$8 sps:$4 sm:$0xff]   ;;  %v1996_v20 = vld [vmem:[%s2768_s1 + $0x2a0] ss:$8 sps:$4 sm:$0xff]  }
  0x49   :  { %1006 = vmatprep.subr.bf16.mxu1 %v1935_v21  ;;  %v1999_v21 = vld [vmem:[%s2768_s1 + $0x3a0] ss:$8 sps:$4 sm:$0xff]  }
  0x4a   :  { %886 = vmatmul.mubr.bf16.gmra.mxu0 %v67_v42  ;;  %v47_v42 = vld [vmem:[%s2769_s0 + $0xa0] sm:$0xff] }
  0x4b   :  { %954 = vmatpush1.bf16.msra.mxu0 %v1930_v22  ;;  %939 = vmatmul.mubr.bf16.gmra.mxu1 %v69_v47  ;;  %v2004_v22 = vld [vmem:[%s2768_s1 + $0x294] ss:$8 sps:$4 sm:$0xff]  }
  0x4c   :  { %1007 = vmatpush1.bf16.msra.mxu1 %v1933_v23  ;;  %955 = vmatprep.subr.bf16.mxu0 %v1938_v24  ;;  %v2007_v23 = vld [vmem:[%s2768_s1 + $0x394] ss:$8 sps:$4 sm:$0xff]   ;;  %v2002_v24 = vld [vmem:[%s2768_s1 + $0x290] ss:$8 sps:$4 sm:$0xff]  }
  0x4d   :  { %1008 = vmatprep.subr.bf16.mxu1 %v1941_v25  ;;  %981 = vmatprep.mubr.bf16.mxu0 %v64_v60  ;;  %v2005_v25 = vld [vmem:[%s2768_s1 + $0x390] ss:$8 sps:$4 sm:$0xff]   ;;  %v2034_v60 = vld [vmem:[%s2770_s3 + $0x14] ss:$8 sps:$4 sm:$0xff]  }
  0x4e   :  { %1034 = vmatprep.mubr.bf16.mxu1 %v66_v61  ;;  %v2032_v61 = vld [vmem:[%s2770_s3 + $0x10] ss:$8 sps:$4 sm:$0xff]  }
  0x4f   :  { %956 = vmatpush1.bf16.msra.mxu0 %v1936_v26  ;;  %v2010_v26 = vld [vmem:[%s2768_s1 + $0x284] ss:$8 sps:$4 sm:$0xff]  }
  0x50   :  { %1009 = vmatpush1.bf16.msra.mxu1 %v1939_v27  ;;  %957 = vmatprep.subr.bf16.mxu0 %v1944_v28  ;;  %v2013_v27 = vld [vmem:[%s2768_s1 + $0x384] ss:$8 sps:$4 sm:$0xff]   ;;  %v2008_v28 = vld [vmem:[%s2768_s1 + $0x280] ss:$8 sps:$4 sm:$0xff]  }
  0x51   :  { %1010 = vmatprep.subr.bf16.mxu1 %v1947_v29  ;;  %v2011_v29 = vld [vmem:[%s2768_s1 + $0x380] ss:$8 sps:$4 sm:$0xff]  }
  0x53   :  { %958 = vmatpush1.bf16.msra.mxu0 %v1942_v30  ;;  %v31_v30 = vld [vmem:[%s2769_s0 + $0x20] sm:$0xff] }
  0x54   :  { %1011 = vmatpush1.bf16.msra.mxu1 %v1945_v31  ;;  %959 = vmatprep.subr.bf16.mxu0 %v1950_v32  ;;  %v39_v31 = vld [vmem:[%s2769_s0 + $0x60] sm:$0xff]  ;;  %v33_v32 = vld [vmem:[%s2769_s0 + $0x30] sm:$0xff] }
  0x55   :  { %1012 = vmatprep.subr.bf16.mxu1 %v1953_v33  ;;  %v41_v33 = vld [vmem:[%s2769_s0 + $0x70] sm:$0xff]  ;;  %v63_v38 = vpack.c.bf16 %v39_v31, %v31_v30 }
  0x56   :  { %v65_v39 = vpack.c.bf16 %v41_v33, %v33_v32 }
  0x57   :  { %960 = vmatpush1.bf16.msra.mxu0 %v1948_v45  ;;  %v57_v45 = vld [vmem:[%s2769_s0 + $0xf0] sm:$0xff] }
  0x58   :  { %1013 = vmatpush1.bf16.msra.mxu1 %v1951_v46  ;;  %961 = vmatprep.subr.bf16.mxu0 %v1956_v48  ;;  %v71_v46 = vpack.c.bf16 %v55_v43, %v47_v42  ;;  %v73_v47 = vpack.c.bf16 %v57_v45, %v49_v44  ;;  %v2014_v48 = vld [vmem:[%s2770_s3 + $0x70] ss:$8 sps:$4 sm:$0xff]   ;;  %v1057_v42 = vlaneseq }
  0x59   :  { %1014 = vmatprep.subr.bf16.mxu1 %v1959_v49  ;;  %v2016_v49 = vld [vmem:[%s2770_s3 + $0x74] ss:$8 sps:$4 sm:$0xff]  }
  0x5b   :  { %962 = vmatpush1.bf16.msra.mxu0 %v1954_v50  ;;  %v2019_v50 = vld [vmem:[%s2770_s3 + $0x64] ss:$8 sps:$4 sm:$0xff]  }
  0x5c   :  { %1015 = vmatpush1.bf16.msra.mxu1 %v1957_v51  ;;  %963 = vmatprep.subr.bf16.mxu0 %v1962_v52  ;;  %v2017_v51 = vld [vmem:[%s2770_s3 + $0x60] ss:$8 sps:$4 sm:$0xff]   ;;  %v2022_v52 = vld [vmem:[%s2770_s3 + $0x54] ss:$8 sps:$4 sm:$0xff]  }
  0x5d   :  { %1016 = vmatprep.subr.bf16.mxu1 %v1965_v53  ;;  %v2020_v53 = vld [vmem:[%s2770_s3 + $0x50] ss:$8 sps:$4 sm:$0xff]  }
  0x5f   :  { %964 = vmatpush1.bf16.msra.mxu0 %v1960_v58  ;;  %v2031_v58 = vld [vmem:[%s2770_s3 + $0x24] ss:$8 sps:$4 sm:$0xff]  }
  0x60   :  { %1017 = vmatpush1.bf16.msra.mxu1 %v1963_v59  ;;  %965 = vmatprep.subr.bf16.mxu0 %v1968_v62  ;;  %v2029_v59 = vld [vmem:[%s2770_s3 + $0x20] ss:$8 sps:$4 sm:$0xff]   ;;  %v2037_v62 = vld [vmem:[%s2770_s3 + $0x4] ss:$8 sps:$4 sm:$0xff]  }
  0x61   :  { %1018 = vmatprep.subr.bf16.mxu1 %v1971_v63  ;;  %v2035_v63 = vld [vmem:[%s2770_s3] ss:$8 sps:$4 sm:$0xff]  }
  0x63   :  { %966 = vmatpush2.bf16.msra.mxu0 %v1966_v0  ;;  %v2040_v0 = vld [vmem:[%s2770_s3 + $0xf4] ss:$8 sps:$4 sm:$0xff]  }
  0x64   :  { %1019 = vmatpush2.bf16.msra.mxu1 %v1969_v1  ;;  %967 = vmatprep.subr.bf16.mxu0 %v1974_v2  ;;  %v2038_v1 = vld [vmem:[%s2770_s3 + $0xf0] ss:$8 sps:$4 sm:$0xff]   ;;  %v2043_v2 = vld [vmem:[%s2770_s3 + $0xe4] ss:$8 sps:$4 sm:$0xff]  }
  0x65   :  { %1020 = vmatprep.subr.bf16.mxu1 %v1977_v3  ;;  %v2041_v3 = vld [vmem:[%s2770_s3 + $0xe0] ss:$8 sps:$4 sm:$0xff]  }
  0x67   :  { %968 = vmatpush2.bf16.msra.mxu0 %v1972_v4  ;;  %v2046_v4 = vld [vmem:[%s2770_s3 + $0xd4] ss:$8 sps:$4 sm:$0xff]  }
  0x68   :  { %1021 = vmatpush2.bf16.msra.mxu1 %v1975_v5  ;;  %969 = vmatprep.subr.bf16.mxu0 %v1980_v6  ;;  %v2044_v5 = vld [vmem:[%s2770_s3 + $0xd0] ss:$8 sps:$4 sm:$0xff]   ;;  %v2049_v6 = vld [vmem:[%s2770_s3 + $0xc4] ss:$8 sps:$4 sm:$0xff]  }
  0x69   :  { %1022 = vmatprep.subr.bf16.mxu1 %v1983_v7  ;;  %v2047_v7 = vld [vmem:[%s2770_s3 + $0xc0] ss:$8 sps:$4 sm:$0xff]  }
  0x6b   :  { %970 = vmatpush2.bf16.msra.mxu0 %v1978_v8  ;;  %v2052_v8 = vld [vmem:[%s2770_s3 + $0xb4] ss:$8 sps:$4 sm:$0xff]  }
  0x6c   :  { %1023 = vmatpush2.bf16.msra.mxu1 %v1981_v9  ;;  %971 = vmatprep.subr.bf16.mxu0 %v1986_v10  ;;  %v2050_v9 = vld [vmem:[%s2770_s3 + $0xb0] ss:$8 sps:$4 sm:$0xff]   ;;  %v2055_v10 = vld [vmem:[%s2770_s3 + $0xa4] ss:$8 sps:$4 sm:$0xff]  }
  0x6d   :  { %1024 = vmatprep.subr.bf16.mxu1 %v1989_v11  ;;  %v2053_v11 = vld [vmem:[%s2770_s3 + $0xa0] ss:$8 sps:$4 sm:$0xff]  }
  0x6f   :  { %972 = vmatpush2.bf16.msra.mxu0 %v1984_v12  ;;  %v2058_v12 = vld [vmem:[%s2770_s3 + $0x94] ss:$8 sps:$4 sm:$0xff]  }
  0x70   :  { %1025 = vmatpush2.bf16.msra.mxu1 %v1987_v13  ;;  %973 = vmatprep.subr.bf16.mxu0 %v1992_v14  ;;  %v2056_v13 = vld [vmem:[%s2770_s3 + $0x90] ss:$8 sps:$4 sm:$0xff]   ;;  %v2061_v14 = vld [vmem:[%s2770_s3 + $0x84] ss:$8 sps:$4 sm:$0xff]  }
  0x71   :  { %1026 = vmatprep.subr.bf16.mxu1 %v1995_v15  ;;  %v2059_v15 = vld [vmem:[%s2770_s3 + $0x80] ss:$8 sps:$4 sm:$0xff]  }
  0x73   :  { %974 = vmatpush2.bf16.msra.mxu0 %v1990_v16  ;;  %v2062_v16 = vld [vmem:[%s2771_s5 + $0x78] sm:$0xff]  }
  0x74   :  { %1027 = vmatpush2.bf16.msra.mxu1 %v1993_v17  ;;  %975 = vmatprep.subr.bf16.mxu0 %v1998_v18  ;;  %v2063_v17 = vld [vmem:[%s2771_s5 + $0x38] sm:$0xff]   ;;  %v2064_v18 = vld [vmem:[%s2771_s5 + $0x70] sm:$0xff]  }
  0x75   :  { %1028 = vmatprep.subr.bf16.mxu1 %v2001_v19  ;;  %v2065_v19 = vld [vmem:[%s2771_s5 + $0x30] sm:$0xff]  }
  0x77   :  { %976 = vmatpush2.bf16.msra.mxu0 %v1996_v20  ;;  %v2066_v20 = vld [vmem:[%s2771_s5 + $0x68] sm:$0xff]  }
  0x78   :  { %1029 = vmatpush2.bf16.msra.mxu1 %v1999_v21  ;;  %977 = vmatprep.subr.bf16.mxu0 %v2004_v22  ;;  %v2067_v21 = vld [vmem:[%s2771_s5 + $0x28] sm:$0xff]   ;;  %v2068_v22 = vld [vmem:[%s2771_s5 + $0x60] sm:$0xff]  }
  0x79   :  { %1030 = vmatprep.subr.bf16.mxu1 %v2007_v23  ;;  %v2069_v23 = vld [vmem:[%s2771_s5 + $0x20] sm:$0xff]  }
  0x7b   :  { %978 = vmatpush2.bf16.msra.mxu0 %v2002_v24  ;;  %v2070_v24 = vld [vmem:[%s2771_s5 + $0x58] sm:$0xff]  }
  0x7c   :  { %1031 = vmatpush2.bf16.msra.mxu1 %v2005_v25  ;;  %979 = vmatprep.subr.bf16.mxu0 %v2010_v26  ;;  %v2071_v25 = vld [vmem:[%s2771_s5 + $0x18] sm:$0xff]   ;;  %v2072_v26 = vld [vmem:[%s2771_s5 + $0x50] sm:$0xff]  }
  0x7d   :  { %1032 = vmatprep.subr.bf16.mxu1 %v2013_v27  ;;  %v2073_v27 = vld [vmem:[%s2771_s5 + $0x10] sm:$0xff]  }
  0x7f   :  { %980 = vmatpush2.bf16.msra.mxu0 %v2008_v28 }
  0x80   :  { %1033 = vmatpush2.bf16.msra.mxu1 %v2011_v29  ;;  %1287 = vmatprep.subr.bf16.mxu0 %v2016_v49 }
  0x81   :  { %1792 = vmatprep.subr.bf16.mxu1 %v2062_v16 }
  0x82   :  { %982 = vmatmul.mubr.bf16.vlgmr.msra.gmra.mxu0 %v63_v38 }
  0x83   :  { %1035 = vmatmul.mubr.bf16.vlgmr.msra.gmra.mxu1 %v65_v39  ;;  %991 = vmatprep.mubr.bf16.mxu0 %v72_v40 }
  0x84   :  { %1044 = vmatprep.mubr.bf16.mxu1 %v74_v41  ;;  %1288 = vmatpush1.bf16.msra.mxu0 %v2014_v48 }
  0x85   :  { %1289 = vmatprep.subr.bf16.mxu0 %v2019_v50  ;;  %1793 = vmatpush3.bf16.msra.mxu1 %v2063_v17 }
  0x86   :  { %1794 = vmatprep.subr.bf16.mxu1 %v2064_v18 }
  0x88   :  { %1290 = vmatpush1.bf16.msra.mxu0 %v2017_v51 }
  0x89   :  { %1291 = vmatprep.subr.bf16.mxu0 %v2022_v52  ;;  %1795 = vmatpush3.bf16.msra.mxu1 %v2065_v19 }
  0x8a   :  { %992 = vmatmul.mubr.bf16.gmra.mxu0 %v71_v46  ;;  %1796 = vmatprep.subr.bf16.mxu1 %v2066_v20  ;;  %v2078_v20 = vmov 1.0|1.0  }
  0x8b   :  { %1045 = vmatmul.mubr.bf16.gmra.mxu1 %v73_v47  ;;  %v2732_v47 = vshrl.u32 %v1057_v42, 7 }
  0x8c   :  { %1292 = vmatpush1.bf16.msra.mxu0 %v2020_v53 }
  0x8d   :  { %1293 = vmatprep.subr.bf16.mxu0 %v2025_v54  ;;  %1797 = vmatpush3.bf16.msra.mxu1 %v2067_v21  ;;  %v1063_v54 = vsub.s32 1, %v2732_v47 }
  0x8e   :  { %1798 = vmatprep.subr.bf16.mxu1 %v2068_v22 }
  0x90   :  { %1294 = vmatpush1.bf16.msra.mxu0 %v2023_v55 }
  0x91   :  { %1295 = vmatprep.subr.bf16.mxu0 %v2028_v56  ;;  %1799 = vmatpush3.bf16.msra.mxu1 %v2069_v23  ;;  %v1059_v56 = vsub.s32 0, %v2732_v47  ;;  %v1788_v47 = vld [vmem:[%s2774_s6] ss:$0 sm:$0xff] }
  0x92   :  { %1800 = vmatprep.subr.bf16.mxu1 %v2070_v24 }
  0x94   :  { %1296 = vmatpush1.bf16.msra.mxu0 %v2026_v57 }
  0x95   :  { %1297 = vmatprep.subr.bf16.mxu0 %v2031_v58  ;;  %1801 = vmatpush3.bf16.msra.mxu1 %v2071_v25 }
  0x96   :  { %1802 = vmatprep.subr.bf16.mxu1 %v2072_v26 }
  0x98   :  { %1298 = vmatpush1.bf16.msra.mxu0 %v2029_v59 }
  0x99   :  { %1299 = vmatprep.subr.bf16.mxu0 %v2034_v60  ;;  %1803 = vmatpush3.bf16.msra.mxu1 %v2073_v27  ;;  %v1055_v60 = vld [vmem:[%s2772_s2] sm:$0x3] }
  0x9c   :  { %1300 = vmatpush1.bf16.msra.mxu0 %v2032_v61 }
  0x9d   :  { %1301 = vmatprep.subr.bf16.mxu0 %v2037_v62 }
  0xa0   :  { %1302 = vmatpush1.bf16.msra.mxu0 %v2035_v63 }
  0xa1   :  { %1303 = vmatprep.subr.bf16.mxu0 %v2040_v0 }
  0xa4   :  { %1304 = vmatpush2.bf16.msra.mxu0 %v2038_v1  ;;  %v1064_v1 = vrot.slane %v1055_v60, %v1063_v54 }
  0xa5   :  { %1305 = vmatprep.subr.bf16.mxu0 %v2043_v2 }
  0xa8   :  { %1306 = vmatpush2.bf16.msra.mxu0 %v2041_v3 }
  0xa9   :  { %1307 = vmatprep.subr.bf16.mxu0 %v2046_v4 }
  0xac   :  { %1308 = vmatpush2.bf16.msra.mxu0 %v2044_v5  ;;  %v1060_v5 = vrot.slane %v1055_v60, %v1059_v56 }
  0xad   :  { %1309 = vmatprep.subr.bf16.mxu0 %v2049_v6 }
  0xb0   :  { %1310 = vmatpush2.bf16.msra.mxu0 %v2047_v7 }
  0xb1   :  { %1311 = vmatprep.subr.bf16.mxu0 %v2052_v8 }
  0xb4   :  { %1312 = vmatpush2.bf16.msra.mxu0 %v2050_v9 }
  0xb5   :  { %1313 = vmatprep.subr.bf16.mxu0 %v2055_v10 }
  0xb8   :  { %1314 = vmatpush2.bf16.msra.mxu0 %v2053_v11 }
  0xb9   :  { %1315 = vmatprep.subr.bf16.mxu0 %v2058_v12 }
  0xbc   :  { %1316 = vmatpush2.bf16.msra.mxu0 %v2056_v13 }
  0xbd   :  { %1317 = vmatprep.subr.bf16.mxu0 %v2061_v14 }
  0xc0   :  { %1318 = vmatpush2.bf16.msra.mxu0 %v2059_v15 }
 0x102   :  { %v877_v28 = vpop.f32.mrf.mxu0 }
 0x103   :  { %v930_v29 = vpop.f32.mrf.mxu1 }
 0x104   :  { %v879_v30 = vpop.f32.mrf.mxu0  ;;  %v931_v49 = vadd.f32 %v930_v29, %v877_v28  ;;  %v2074_v28 = vld [vmem:[%s2771_s5 + $0x48] sm:$0xff]  }
 0x105   :  { %v932_v31 = vpop.f32.mrf.mxu1  ;;  %v2075_v29 = vld [vmem:[%s2771_s5 + $0x8] sm:$0xff]   ;;  %1804 = vmatprep.subr.bf16.mxu1 %v2074_v28 }
 0x106   :  { %v881_v32 = vpop.f32.mrf.mxu0  ;;  %v933_v48 = vadd.f32 %v932_v31, %v879_v30  ;;  %1805 = vmatpush3.bf16.msra.mxu1 %v2075_v29  ;;  %v2076_v30 = vld [vmem:[%s2771_s5 + $0x40] sm:$0xff]  }
 0x107   :  { %v934_v33 = vpop.f32.mrf.mxu1  ;;  %v2077_v31 = vld [vmem:[%s2771_s5] sm:$0xff]   ;;  %1806 = vmatprep.subr.bf16.mxu1 %v2076_v30 }
 0x108   :  { %v883_v34 = vpop.f32.mrf.mxu0  ;;  %v935_v52 = vadd.f32 %v934_v33, %v881_v32  ;;  %v1340_v33 = vld [vmem:[%s2773_s4] sm:$0x3] }
 0x109   :  { %v936_v35 = vpop.f32.mrf.mxu1 }
 0x10a   :  { %v887_v36 = vpop.f32.mrf.mxu0  ;;  %v937_v59 = vadd.f32 %v936_v35, %v883_v34  ;;  %1807 = vmatpush3.bf16.msra.mxu1 %v2077_v31  ;;  %v1349_v35 = vrot.slane %v1340_v33, %v1063_v54 }
 0x10b   :  { %v940_v37 = vpop.f32.mrf.mxu1 }
 0x10c   :  { %v889_v38 = vpop.f32.mrf.mxu0  ;;  %v941_v10 = vadd.f32 %v940_v37, %v887_v36  ;;  %v1345_v36 = vrot.slane %v1340_v33, %v1059_v56 }
 0x10d   :  { %v942_v39 = vpop.f32.mrf.mxu1 }
 0x10e   :  { %v891_v40 = vpop.f32.mrf.mxu0  ;;  %v943_v8 = vadd.f32 %v942_v39, %v889_v38 }
 0x10f   :  { %v944_v41 = vpop.f32.mrf.mxu1 }
 0x110   :  { %v893_v43 = vpop.f32.mrf.mxu0  ;;  %v945_v13 = vadd.f32 %v944_v41, %v891_v40 }
 0x111   :  { %v946_v44 = vpop.f32.mrf.mxu1 }
 0x112   :  { %v947_v18 = vadd.f32 %v946_v44, %v893_v43 }
 0x142   :  { %v983_v45 = vpop.f32.mrf.mxu0 }
 0x143   :  { %v1036_v46 = vpop.f32.mrf.mxu1  ;;  %v984_v55 = vadd.f32 %v983_v45, %v931_v49 }
 0x144   :  { %v985_v50 = vpop.f32.mrf.mxu0 }
 0x145   :  { %v1038_v51 = vpop.f32.mrf.mxu1  ;;  %v986_v53 = vadd.f32 %v985_v50, %v933_v48  ;;  %v1037_v4 = vadd.f32 %v1036_v46, %v984_v55 }
 0x146   :  { %v987_v57 = vpop.f32.mrf.mxu0 }
 0x147   :  { %v1040_v58 = vpop.f32.mrf.mxu1  ;;  %v988_v61 = vadd.f32 %v987_v57, %v935_v52  ;;  %v1039_v0 = vadd.f32 %v1038_v51, %v986_v53  ;;  %vm1067_vm3 = vcmp.ge.f32.partialorder %v1037_v4, %v1060_v5  ;;  %v2079_v51 = vmov 0.0  }
 0x148   :  { %v989_v62 = vpop.f32.mrf.mxu0 }
 0x149   :  { %v1042_v63 = vpop.f32.mrf.mxu1  ;;  %v1041_v2 = vadd.f32 %v1040_v58, %v988_v61  ;;  %v990_v3 = vadd.f32 %v989_v62, %v937_v59  ;;  %vm1068_vm1 = vcmp.ge.f32.partialorder %v1039_v0, %v1064_v1 }
 0x14a   :  { %v993_v6 = vpop.f32.mrf.mxu0 }
 0x14b   :  { %v1046_v7 = vpop.f32.mrf.mxu1  ;;  %v1043_v9 = vadd.f32 %v1042_v63, %v990_v3  ;;  %vm1069_vm0 = vcmp.ge.f32.partialorder %v1041_v2, %v1060_v5  ;;  %v994_v15 = vadd.f32 %v993_v6, %v941_v10 }
 0x14c   :  { %v995_v11 = vpop.f32.mrf.mxu0  ;;  %vm1750_vm5 = vmpackc.low %vm1069_vm0, %vm1067_vm3 }
 0x14d   :  { %v1048_v12 = vpop.f32.mrf.mxu1  ;;  %vm1070_vm2 = vcmp.ge.f32.partialorder %v1043_v9, %v1064_v1  ;;  %v996_v14 = vadd.f32 %v995_v11, %v943_v8  ;;  %v1047_v25 = vadd.f32 %v1046_v7, %v994_v15 }
 0x14e   :  { %v997_v16 = vpop.f32.mrf.mxu0  ;;  %vm1748_vm4 = vmpackc.low %vm1070_vm2, %vm1068_vm1 }
 0x14f   :  { %v1050_v17 = vpop.f32.mrf.mxu1  ;;  %v998_v19 = vadd.f32 %v997_v16, %v945_v13  ;;  %1749 = vmatprep.mubr.msk.bf16.mxu0 %vm1748_vm4, %v2078_v20  ;;  %v1049_v22 = vadd.f32 %v1048_v12, %v996_v14  ;;  %vm1071_vm9 = vcmp.ge.f32.partialorder %v1047_v25, %v1060_v5 }
 0x150   :  { %v999_v21 = vpop.f32.mrf.mxu0  ;;  %1751 = vmatmul.mubr.msk.bf16.vlgmr.msra.gmra.mxu0 %vm1750_vm5, %v2078_v20 }
 0x151   :  { %v1051_v23 = vadd.f32 %v1050_v17, %v998_v19  ;;  %v1000_v24 = vadd.f32 %v999_v21, %v947_v18  ;;  %v1052_v26 = vpop.f32.mrf.mxu1  ;;  %vm1072_vm7 = vcmp.ge.f32.partialorder %v1049_v22, %v1064_v1 }
 0x153   :  { %v1053_v27 = vadd.f32 %v1052_v26, %v1000_v24  ;;  %vm1073_vm6 = vcmp.ge.f32.partialorder %v1051_v23, %v1060_v5 }
 0x154   :  { %vm1754_vm11 = vmpackc.low %vm1073_vm6, %vm1071_vm9 }
 0x155   :  { %vm1074_vm8 = vcmp.ge.f32.partialorder %v1053_v27, %v1064_v1 }
 0x156   :  { %vm1752_vm10 = vmpackc.low %vm1074_vm8, %vm1072_vm7 }
 0x157   :  { %1753 = vmatprep.mubr.msk.bf16.mxu0 %vm1752_vm10, %v2078_v20 }
 0x158   :  { %1755 = vmatmul.mubr.msk.bf16.gmra.mxu0 %vm1754_vm11, %v2078_v20 }
 0x210   :  { %v1321_v32 = vpop.f32.mrf.mxu0 }
 0x211   :  { %vm1352_vm15 = vcmp.ge.f32.partialorder %v1321_v32, %v1345_v36 }
 0x212   :  { %v1323_v34 = vpop.f32.mrf.mxu0 }
 0x213   :  { %vm1353_vm13 = vcmp.ge.f32.partialorder %v1323_v34, %v1349_v35 }
 0x214   :  { %v1325_v37 = vpop.f32.mrf.mxu0 }
 0x215   :  { %vm1354_vm12 = vcmp.ge.f32.partialorder %v1325_v37, %v1345_v36 }
 0x216   :  { %v1327_v38 = vpop.f32.mrf.mxu0  ;;  %vm1782_vm1 = vmpackc.low %vm1354_vm12, %vm1352_vm15 }
 0x217   :  { %vm1355_vm14 = vcmp.ge.f32.partialorder %v1327_v38, %v1349_v35 }
 0x218   :  { %vm1780_vm0 = vmpackc.low %vm1355_vm14, %vm1353_vm13  ;;  %v1331_v39 = vpop.f32.mrf.mxu0 }
 0x219   :  { %1781 = vmatprep.mubr.msk.bf16.mxu1 %vm1780_vm0, %v2078_v20  ;;  %vm1356_vm5 = vcmp.ge.f32.partialorder %v1331_v39, %v1345_v36 }
 0x21a   :  { %v1333_v40 = vpop.f32.mrf.mxu0  ;;  %1783 = vmatmul.mubr.msk.bf16.vlgmr.msra.gmra.mxu1 %vm1782_vm1, %v2078_v20 }
 0x21b   :  { %vm1357_vm3 = vcmp.ge.f32.partialorder %v1333_v40, %v1349_v35 }
 0x21c   :  { %v1335_v41 = vpop.f32.mrf.mxu0 }
 0x21d   :  { %vm1358_vm2 = vcmp.ge.f32.partialorder %v1335_v41, %v1345_v36 }
 0x21e   :  { %v1337_v42 = vpop.f32.mrf.mxu0  ;;  %vm1786_vm7 = vmpackc.low %vm1358_vm2, %vm1356_vm5 }
 0x21f   :  { %vm1359_vm4 = vcmp.ge.f32.partialorder %v1337_v42, %v1349_v35 }
 0x220   :  { %vm1784_vm6 = vmpackc.low %vm1359_vm4, %vm1357_vm3 }
 0x221   :  { %1785 = vmatprep.mubr.msk.bf16.mxu1 %vm1784_vm6, %v2078_v20 }
 0x222   :  { %1787 = vmatmul.mubr.msk.bf16.gmra.mxu1 %vm1786_vm7, %v2078_v20 }
 0x2da   :  { %v1808_v43 = vpop.f32.mrf.mxu1 }
 0x2dc   :  { %v1809_v44 = vpop.f32.mrf.mxu1 }
 0x2dd   :  { %v1810_v46 = vadd.f32 %v1809_v44, %v1808_v43 }
 0x2de   :  { %v1811_v45 = vpop.f32.mrf.mxu1 }
 0x2df   :  { %vm1563_vm8 = vcmp.ge.f32.partialorder %v1810_v46, %v1788_v47 }
 0x2e0   :  { %v1812_v48 = vpop.f32.mrf.mxu1  ;;  %v1789_v55 = vsel %vm1563_vm8, 1.0, %v2079_v51 }
 0x2e1   :  { %v1813_v49 = vadd.f32 %v1812_v48, %v1811_v45 }
 0x2e2   :  { %v1814_v50 = vpop.f32.mrf.mxu1 }
 0x2e3   :  { %vm1564_vm9 = vcmp.ge.f32.partialorder %v1813_v49, %v1788_v47 }
 0x2e4   :  { %v1790_v52 = vsel %vm1564_vm9, 1.0, %v2079_v51  ;;  %v1815_v53 = vpop.f32.mrf.mxu1 }
 0x2e5   :  { %v1816_v54 = vadd.f32 %v1815_v53, %v1814_v50  ;;  %v1572_v57 = vadd.f32 %v1790_v52, %v1789_v55 }
 0x2e6   :  { %v1817_v56 = vpop.f32.mrf.mxu1 }
 0x2e7   :  { %vm1565_vm10 = vcmp.ge.f32.partialorder %v1816_v54, %v1788_v47 }
 0x2e8   :  { %v1791_v58 = vsel %vm1565_vm10, 1.0, %v2079_v51  ;;  %v1818_v59 = vpop.f32.mrf.mxu1 }
 0x2e9   :  { %v1573_v60 = vadd.f32 %v1791_v58, %v1572_v57 }
 0x2eb   :  { %v1574_v61 = vmul.f32 0.33333334, %v1573_v60 }
 0x2ed   :  { %1575 = vst [vmem:[%s2775_s7] sm:$0xff] %v1574_v61 }

</bundles_post_ra>
